<compile_context>
chip_gen: v7x
topology: tpu7x:2x2x1
jax: 0.10.0
libtpu: 0.0.40
codegen_flags: <defaults>
</compile_context>

<pallas_src>
import functools

import jax
import jax.numpy as jnp
from jax.experimental import pallas as pl
from jax.experimental.pallas import tpu as pltpu

_LANE = 128
_SUBLANE = 8
_MAX_BLOCK_ROWS = 2048          # 2048 x 128 f32 = 1 MiB per block buffer


def _round_up(x, m):
    return (x + m - 1) // m * m


def _gather_kernel(ktbl_ref, idx_ref, out_ref, *, table_size, small_table):
    # ktbl_ref: (T,)          float32 SMEM  (precomputed k per table entry, resident)
    # idx_ref:  (BR, 128)     int32   VMEM  (sublane+lane dense batch tile)
    # out_ref:  (BR, 128)     float32 VMEM
    idx = idx_ref[...]
    zero = jnp.zeros(idx.shape, jnp.float32)

    # TODO(synk): for T <= 128 a true dynamic lane gather (table on lanes +
    # jnp.take) would drop per-element cost to O(1); kept the where-chain here
    # because its Mosaic lowering is known-good.
    if small_table:
        # Static trip count -> straight-line code (2 VALU ops / element / entry).
        acc = zero
        for t in range(table_size):
            acc = jnp.where(idx == t, ktbl_ref[t], acc)
        out_ref[...] = acc
    else:
        def body(t, acc):
            return jnp.where(idx == t, ktbl_ref[t], acc)
        out_ref[...] = jax.lax.fori_loop(0, table_size, body, zero, unroll=8)


@jax.jit
def _get_k_from_hscore_impl(t_list, t_hscore, w1, b1, w2, b2):
    n = t_list.shape[0]
    t = t_hscore.shape[0]

    # Hoist the scalar MLP onto the table once (O(T) XLA elementwise work).
    k_tbl = jnp.maximum(t_hscore.astype(jnp.float32) * w1 + b1, 0.0) * w2 + b2

    # ---- static tiling math (all derived from static shapes) ----
    n_rows = max(1, pl.cdiv(n, _LANE))
    n_rows_pad = _round_up(n_rows, _SUBLANE)

    num_blocks = pl.cdiv(n_rows_pad, _MAX_BLOCK_ROWS)
    if n_rows_pad >= 2 * _SUBLANE:
        # Keep >= 2 grid steps so the "parallel" axis can use both v7x TCs.
        num_blocks = max(num_blocks, 2)
    block_rows = _round_up(pl.cdiv(n_rows_pad, num_blocks), _SUBLANE)
    n_rows_pad = _round_up(n_rows_pad, block_rows)
    n_pad = n_rows_pad * _LANE
    grid = (n_rows_pad // block_rows,)

    # Sublane+lane dense index layout; padded entries are sliced off at the end.
    idx2d = (jnp.zeros((n_pad,), jnp.int32)
             .at[:n].set(t_list.astype(jnp.int32))
             .reshape(n_rows_pad, _LANE))

    kernel = functools.partial(_gather_kernel, table_size=t,
                               small_table=(t <= 256))

    # VMEM need: idx + out blocks, double buffered (~4 block buffers) -> tiny;
    # 16 MiB floor / 64 MiB cap fits every generation's scoped limit.
    block_bytes = block_rows * _LANE * 4
    vmem_limit = min(64 * 1024 * 1024, max(16 * 1024 * 1024, 8 * block_bytes))

    out = pl.pallas_call(
        kernel,
        out_shape=jax.ShapeDtypeStruct((n_rows_pad, _LANE), jnp.float32),
        grid=grid,
        in_specs=[
            pl.BlockSpec(memory_space=pltpu.MemorySpace.SMEM),       # k table
            pl.BlockSpec((block_rows, _LANE), lambda i: (i, 0)),      # indices
        ],
        out_specs=pl.BlockSpec((block_rows, _LANE), lambda i: (i, 0)),
        compiler_params=pltpu.CompilerParams(
            dimension_semantics=("parallel",),
            vmem_limit_bytes=vmem_limit),
    )(k_tbl, idx2d)

    return out.reshape(-1)[:n]   # == k.squeeze(1)


def get_k_from_hscore_pallas(t_list, t_hscore, w1, b1, w2, b2):
    """t_list: (N,) integer indices; t_hscore: (T,) float table. Returns (N,) f32."""
    return _get_k_from_hscore_impl(
        jnp.asarray(t_list), jnp.asarray(t_hscore, jnp.float32),
        jnp.float32(w1), jnp.float32(b1), jnp.float32(w2), jnp.float32(b2))


def _reference(t_list, t_hscore, w1, b1, w2, b2):
    hs = t_hscore[t_list].astype(jnp.float32)
    l1 = hs * w1 + b1
    act = jnp.maximum(l1, 0.0)
    return act * w2 + b2


if __name__ == "__main__":
    key = jax.random.PRNGKey(0)
    k_table, k_idx, k_w = jax.random.split(key, 3)

    T = 16   # number of entries in the hierarchical-score table
    N = 8    # batch of timestep indices (len(t_list))

    t_hscore = jax.random.uniform(k_table, (T,), dtype=jnp.float32)
    t_list = jax.random.randint(k_idx, (N,), 0, T, dtype=jnp.int32)

    # Deterministic "Linear(1,1)" parameters (weight is a 1x1 matrix -> scalar).
    wvals = jax.random.normal(k_w, (4,), dtype=jnp.float32)
    w1, b1, w2, b2 = (float(wvals[0]), float(wvals[1]),
                      float(wvals[2]), float(wvals[3]))

    out = get_k_from_hscore_pallas(t_list, t_hscore, w1, b1, w2, b2)
    out = jax.block_until_ready(out)

    ref = _reference(t_list, t_hscore, w1, b1, w2, b2)
    assert out.shape == (N,), out.shape
    assert jnp.allclose(out, ref, atol=1e-5, rtol=1e-5), (out, ref)

    print("KERNEL_OK")
</pallas_src>

<mosaic_0001>
module attributes {stable_mosaic.version = 11 : i64} {
  func.func @_gather_kernel(%arg0: i32, %arg1: memref<16xf32, #tpu.memory_space<smem>>, %arg2: memref<8x128xi32, #tpu.memory_space<vmem>>, %arg3: memref<8x128xf32, #tpu.memory_space<vmem>>) attributes {dimension_semantics = [#tpu.dimension_semantics<parallel>], iteration_bounds = array<i64: 1>, scalar_prefetch = 0 : i64, scratch_operands = 0 : i64, tpu.core_type = #tpu.core_type<tc>, window_params = [{transform_indices = @transform_0, window_bounds = array<i64: 16>}, {transform_indices = @transform_1, window_bounds = array<i64: 8, 128>}, {transform_indices = @transform_2, window_bounds = array<i64: 8, 128>}]} {
    %c0 = arith.constant 0 : index
    %c0_0 = arith.constant 0 : index
    %0 = vector.load %arg2[%c0, %c0_0] : memref<8x128xi32, #tpu.memory_space<vmem>>, vector<8x128xi32>
    %cst = arith.constant 0.000000e+00 : f32
    %1 = vector.broadcast %cst : f32 to vector<8x128xf32>
    %c0_i32 = arith.constant 0 : i32
    %2 = vector.broadcast %c0_i32 : i32 to vector<8x128xi32>
    %3 = arith.cmpi eq, %0, %2 : vector<8x128xi32>
    %c0_1 = arith.constant 0 : index
    %4 = memref.load %arg1[%c0_1] : memref<16xf32, #tpu.memory_space<smem>>
    %5 = vector.broadcast %4 : f32 to vector<8x128xf32>
    %6 = arith.select %3, %5, %1 : vector<8x128xi1>, vector<8x128xf32>
    %c1_i32 = arith.constant 1 : i32
    %7 = vector.broadcast %c1_i32 : i32 to vector<8x128xi32>
    %8 = arith.cmpi eq, %0, %7 : vector<8x128xi32>
    %c1 = arith.constant 1 : index
    %9 = memref.load %arg1[%c1] : memref<16xf32, #tpu.memory_space<smem>>
    %10 = vector.broadcast %9 : f32 to vector<8x128xf32>
    %11 = arith.select %8, %10, %6 : vector<8x128xi1>, vector<8x128xf32>
    %c2_i32 = arith.constant 2 : i32
    %12 = vector.broadcast %c2_i32 : i32 to vector<8x128xi32>
    %13 = arith.cmpi eq, %0, %12 : vector<8x128xi32>
    %c2 = arith.constant 2 : index
    %14 = memref.load %arg1[%c2] : memref<16xf32, #tpu.memory_space<smem>>
    %15 = vector.broadcast %14 : f32 to vector<8x128xf32>
    %16 = arith.select %13, %15, %11 : vector<8x128xi1>, vector<8x128xf32>
    %c3_i32 = arith.constant 3 : i32
    %17 = vector.broadcast %c3_i32 : i32 to vector<8x128xi32>
    %18 = arith.cmpi eq, %0, %17 : vector<8x128xi32>
    %c3 = arith.constant 3 : index
    %19 = memref.load %arg1[%c3] : memref<16xf32, #tpu.memory_space<smem>>
    %20 = vector.broadcast %19 : f32 to vector<8x128xf32>
    %21 = arith.select %18, %20, %16 : vector<8x128xi1>, vector<8x128xf32>
    %c4_i32 = arith.constant 4 : i32
    %22 = vector.broadcast %c4_i32 : i32 to vector<8x128xi32>
    %23 = arith.cmpi eq, %0, %22 : vector<8x128xi32>
    %c4 = arith.constant 4 : index
    %24 = memref.load %arg1[%c4] : memref<16xf32, #tpu.memory_space<smem>>
    %25 = vector.broadcast %24 : f32 to vector<8x128xf32>
    %26 = arith.select %23, %25, %21 : vector<8x128xi1>, vector<8x128xf32>
    %c5_i32 = arith.constant 5 : i32
    %27 = vector.broadcast %c5_i32 : i32 to vector<8x128xi32>
    %28 = arith.cmpi eq, %0, %27 : vector<8x128xi32>
    %c5 = arith.constant 5 : index
    %29 = memref.load %arg1[%c5] : memref<16xf32, #tpu.memory_space<smem>>
    %30 = vector.broadcast %29 : f32 to vector<8x128xf32>
    %31 = arith.select %28, %30, %26 : vector<8x128xi1>, vector<8x128xf32>
    %c6_i32 = arith.constant 6 : i32
    %32 = vector.broadcast %c6_i32 : i32 to vector<8x128xi32>
    %33 = arith.cmpi eq, %0, %32 : vector<8x128xi32>
    %c6 = arith.constant 6 : index
    %34 = memref.load %arg1[%c6] : memref<16xf32, #tpu.memory_space<smem>>
    %35 = vector.broadcast %34 : f32 to vector<8x128xf32>
    %36 = arith.select %33, %35, %31 : vector<8x128xi1>, vector<8x128xf32>
    %c7_i32 = arith.constant 7 : i32
    %37 = vector.broadcast %c7_i32 : i32 to vector<8x128xi32>
    %38 = arith.cmpi eq, %0, %37 : vector<8x128xi32>
    %c7 = arith.constant 7 : index
    %39 = memref.load %arg1[%c7] : memref<16xf32, #tpu.memory_space<smem>>
    %40 = vector.broadcast %39 : f32 to vector<8x128xf32>
    %41 = arith.select %38, %40, %36 : vector<8x128xi1>, vector<8x128xf32>
    %c8_i32 = arith.constant 8 : i32
    %42 = vector.broadcast %c8_i32 : i32 to vector<8x128xi32>
    %43 = arith.cmpi eq, %0, %42 : vector<8x128xi32>
    %c8 = arith.constant 8 : index
    %44 = memref.load %arg1[%c8] : memref<16xf32, #tpu.memory_space<smem>>
    %45 = vector.broadcast %44 : f32 to vector<8x128xf32>
    %46 = arith.select %43, %45, %41 : vector<8x128xi1>, vector<8x128xf32>
    %c9_i32 = arith.constant 9 : i32
    %47 = vector.broadcast %c9_i32 : i32 to vector<8x128xi32>
    %48 = arith.cmpi eq, %0, %47 : vector<8x128xi32>
    %c9 = arith.constant 9 : index
    %49 = memref.load %arg1[%c9] : memref<16xf32, #tpu.memory_space<smem>>
    %50 = vector.broadcast %49 : f32 to vector<8x128xf32>
    %51 = arith.select %48, %50, %46 : vector<8x128xi1>, vector<8x128xf32>
    %c10_i32 = arith.constant 10 : i32
    %52 = vector.broadcast %c10_i32 : i32 to vector<8x128xi32>
    %53 = arith.cmpi eq, %0, %52 : vector<8x128xi32>
    %c10 = arith.constant 10 : index
    %54 = memref.load %arg1[%c10] : memref<16xf32, #tpu.memory_space<smem>>
    %55 = vector.broadcast %54 : f32 to vector<8x128xf32>
    %56 = arith.select %53, %55, %51 : vector<8x128xi1>, vector<8x128xf32>
    %c11_i32 = arith.constant 11 : i32
    %57 = vector.broadcast %c11_i32 : i32 to vector<8x128xi32>
    %58 = arith.cmpi eq, %0, %57 : vector<8x128xi32>
    %c11 = arith.constant 11 : index
    %59 = memref.load %arg1[%c11] : memref<16xf32, #tpu.memory_space<smem>>
    %60 = vector.broadcast %59 : f32 to vector<8x128xf32>
    %61 = arith.select %58, %60, %56 : vector<8x128xi1>, vector<8x128xf32>
    %c12_i32 = arith.constant 12 : i32
    %62 = vector.broadcast %c12_i32 : i32 to vector<8x128xi32>
    %63 = arith.cmpi eq, %0, %62 : vector<8x128xi32>
    %c12 = arith.constant 12 : index
    %64 = memref.load %arg1[%c12] : memref<16xf32, #tpu.memory_space<smem>>
    %65 = vector.broadcast %64 : f32 to vector<8x128xf32>
    %66 = arith.select %63, %65, %61 : vector<8x128xi1>, vector<8x128xf32>
    %c13_i32 = arith.constant 13 : i32
    %67 = vector.broadcast %c13_i32 : i32 to vector<8x128xi32>
    %68 = arith.cmpi eq, %0, %67 : vector<8x128xi32>
    %c13 = arith.constant 13 : index
    %69 = memref.load %arg1[%c13] : memref<16xf32, #tpu.memory_space<smem>>
    %70 = vector.broadcast %69 : f32 to vector<8x128xf32>
    %71 = arith.select %68, %70, %66 : vector<8x128xi1>, vector<8x128xf32>
    %c14_i32 = arith.constant 14 : i32
    %72 = vector.broadcast %c14_i32 : i32 to vector<8x128xi32>
    %73 = arith.cmpi eq, %0, %72 : vector<8x128xi32>
    %c14 = arith.constant 14 : index
    %74 = memref.load %arg1[%c14] : memref<16xf32, #tpu.memory_space<smem>>
    %75 = vector.broadcast %74 : f32 to vector<8x128xf32>
    %76 = arith.select %73, %75, %71 : vector<8x128xi1>, vector<8x128xf32>
    %c15_i32 = arith.constant 15 : i32
    %77 = vector.broadcast %c15_i32 : i32 to vector<8x128xi32>
    %78 = arith.cmpi eq, %0, %77 : vector<8x128xi32>
    %c15 = arith.constant 15 : index
    %79 = memref.load %arg1[%c15] : memref<16xf32, #tpu.memory_space<smem>>
    %80 = vector.broadcast %79 : f32 to vector<8x128xf32>
    %81 = arith.select %78, %80, %76 : vector<8x128xi1>, vector<8x128xf32>
    %c0_2 = arith.constant 0 : index
    %c0_3 = arith.constant 0 : index
    %82 = vector.load %arg3[%c0_2, %c0_3] : memref<8x128xf32, #tpu.memory_space<vmem>>, vector<8x128xf32>
    tpu.vector_store %arg3[%c0_2, %c0_3], %81 {strides = array<i32>} : memref<8x128xf32, #tpu.memory_space<vmem>>, vector<8x128xf32>,
    return
  }
  func.func @transform_0(%arg0: i32) -> i32 {
    %c0_i32 = arith.constant 0 : i32
    %c0_i32_0 = arith.constant 0 : i32
    return %c0_i32 : i32
  }
  func.func @transform_1(%arg0: i32) -> (i32, i32) {
    %c0_i32 = arith.constant 0 : i32
    %c0_i32_0 = arith.constant 0 : i32
    return %arg0, %c0_i32 : i32, i32
  }
  func.func @transform_2(%arg0: i32) -> (i32, i32) {
    %c0_i32 = arith.constant 0 : i32
    %c0_i32_0 = arith.constant 0 : i32
    return %arg0, %c0_i32 : i32, i32
  }
}

</mosaic_0001>

<bundles_post_ra>
// kernel: _get_k_from_hscore_impl.1
= control target key start
LH: loop header
LB: loop body
LE: loop exit
PB: predicated region body
PF: predicated region fallthrough
CT: control target
= control target key end

     0   :  { %7 = vsyncpa [#allocation3], 0  ;;  %s195_s0 = inlined_call_operand.vmem [shape: f32[16], index: 0, kind: input, shape index: {}]   ;;  %s196_s1 = inlined_call_operand.vmem [shape: s32[8,128], index: 1, kind: input, shape index: {}]   ;;  %s197_s2 = inlined_call_operand.vmem [shape: f32[8,128], index: 2, kind: output, shape index: {}]  }
   0x1   :  { %s14_s11 = sshll.u32 %s195_s0, 4  ;;  %s15_s11 = int_to_ptr.vmem [resolvable:$true] %s14_s11 }
   0x2   :  { %s111_s12 = scalar_lea.vmem %s15_s11, 16  ;;  %p116_p1 = scmp.lt.s32.totalorder %s15_s11, %s15_s11 }
   0x3   :  { %p112_p0 = scmp.ne.s32.totalorder %s15_s11, %s111_s12  ;;  %p117_p2 = scmp.lt.s32.totalorder %s111_s12, %s111_s12 }
   0x5   :  { %p118_p3 = por %p117_p2, %p116_p1 }
   0x7   :  { %p119_p4 = pnand %p118_p3, %p112_p0 }
   0x9   :  { %122 = shalt.err (!%p119_p4)
}
   0xa   :  { %s125_s13 = smov [#allocation2]  }
   0xb   :  { %17 = dma.vmem_to_smem %s15_s11, 16, %s125_s13, [#allocation3]  }
   0xc   :  { %123 = dma.done.wait [#allocation3], 16  }
   0xd   :  { %124 = vsyncadd [#allocation3], 4294967280 }
   0xe   :  { %23 = sfence }
   0xf   :  { %s26_s14 = sld [smem:[#allocation2]]  ;;  %s95_s15 = sld [smem:[#allocation2 + $0x1]]  ;;  %v147_v0 = vld [vmem:[%s196_s1] sm:$0xff] }
  0x10   :  { %s96_s0 = sld [smem:[#allocation2 + $0x2]]  ;;  %s97_s18 = sld [smem:[#allocation2 + $0x3]]  ;;  %vm25_vm0 = vcmp.eq.s32.totalorder %v147_v0, 0  ;;  %vm29_vm1 = vcmp.eq.s32.totalorder %v147_v0, 1  ;;  %vm33_vm2 = vcmp.eq.s32.totalorder %v147_v0, 2  ;;  %vm37_vm3 = vcmp.eq.s32.totalorder %v147_v0, 3 }
  0x11   :  { %s98_s19 = sld [smem:[#allocation2 + $0x4]]  ;;  %s149_s20 = sld [smem:[#allocation2 + $0x5]]  ;;  %vm41_vm4 = vcmp.eq.s32.totalorder %v147_v0, 4  ;;  %vm45_vm5 = vcmp.eq.s32.totalorder %v147_v0, 5  ;;  %vm49_vm6 = vcmp.eq.s32.totalorder %v147_v0, 6  ;;  %vm53_vm7 = vcmp.eq.s32.totalorder %v147_v0, 7 }
  0x12   :  { %s151_s21 = sld [smem:[#allocation2 + $0x6]]  ;;  %s154_s22 = sld [smem:[#allocation2 + $0x7]]  ;;  %vm57_vm8 = vcmp.eq.s32.totalorder %v147_v0, 8  ;;  %vm61_vm9 = vcmp.eq.s32.totalorder %v147_v0, 9  ;;  %vm65_vm10 = vcmp.eq.s32.totalorder %v147_v0, 10  ;;  %vm69_vm11 = vcmp.eq.s32.totalorder %v147_v0, 11 }
  0x13   :  { %s156_s23 = sld [smem:[#allocation2 + $0x8]]  ;;  %s159_s24 = sld [smem:[#allocation2 + $0x9]]  ;;  %vm73_vm12 = vcmp.eq.s32.totalorder %v147_v0, 12  ;;  %vm77_vm13 = vcmp.eq.s32.totalorder %v147_v0, 13  ;;  %vm81_vm14 = vcmp.eq.s32.totalorder %v147_v0, 14  ;;  %vm85_vm15 = vcmp.eq.s32.totalorder %v147_v0, 15 }
  0x14   :  { %s162_s1 = sld [smem:[#allocation2 + $0xa]]  ;;  %s165_s25 = sld [smem:[#allocation2 + $0xb]] }
  0x15   :  { %v27_v1 = vstv %s26_s14  ;;  %v31_v2 = vstv %s95_s15  ;;  %s168_s26 = sld [smem:[#allocation2 + $0xc]]  ;;  %s172_s27 = sld [smem:[#allocation2 + $0xd]] }
  0x16   :  { %v28_v3 = vsel %vm25_vm0, %v27_v1, 0.0  ;;  %v35_v4 = vstv %s96_s0  ;;  %v39_v6 = vstv %s97_s18  ;;  %s108_s28 = sld [smem:[#allocation2 + $0xe]]  ;;  %s109_s29 = sld [smem:[#allocation2 + $0xf]] }
  0x17   :  { %v32_v5 = vsel %vm29_vm1, %v31_v2, %v28_v3  ;;  %v43_v7 = vstv %s98_s19  ;;  %v47_v9 = vstv %s149_s20 }
  0x18   :  { %v36_v8 = vsel %vm33_vm2, %v35_v4, %v32_v5  ;;  %v51_v11 = vstv %s151_s21  ;;  %v55_v13 = vstv %s154_s22 }
  0x19   :  { %v40_v10 = vsel %vm37_vm3, %v39_v6, %v36_v8  ;;  %v59_v15 = vstv %s156_s23  ;;  %v63_v17 = vstv %s159_s24 }
  0x1a   :  { %v44_v12 = vsel %vm41_vm4, %v43_v7, %v40_v10  ;;  %v67_v19 = vstv %s162_s1  ;;  %v71_v21 = vstv %s165_s25 }
  0x1b   :  { %v48_v14 = vsel %vm45_vm5, %v47_v9, %v44_v12  ;;  %v75_v23 = vstv %s168_s26  ;;  %v79_v25 = vstv %s172_s27 }
  0x1c   :  { %v52_v16 = vsel %vm49_vm6, %v51_v11, %v48_v14  ;;  %v83_v27 = vstv %s108_s28  ;;  %v87_v29 = vstv %s109_s29 }
  0x1d   :  { %v56_v18 = vsel %vm53_vm7, %v55_v13, %v52_v16 }
  0x1e   :  { %v60_v20 = vsel %vm57_vm8, %v59_v15, %v56_v18 }
  0x1f   :  { %v64_v22 = vsel %vm61_vm9, %v63_v17, %v60_v20 }
  0x20   :  { %v68_v24 = vsel %vm65_vm10, %v67_v19, %v64_v22 }
  0x21   :  { %v72_v26 = vsel %vm69_vm11, %v71_v21, %v68_v24 }
  0x22   :  { %v76_v28 = vsel %vm73_vm12, %v75_v23, %v72_v26 }
  0x23   :  { %v80_v30 = vsel %vm77_vm13, %v79_v25, %v76_v28 }
  0x24   :  { %v84_v31 = vsel %vm81_vm14, %v83_v27, %v80_v30 }
  0x25   :  { %v88_v32 = vsel %vm85_vm15, %v87_v29, %v84_v31 }
  0x26   :  { %89 = vst [vmem:[%s197_s2] sm:$0xff] %v88_v32 }
  0x27   :  { %94 = vsyncpa [#allocation3], 1 }

</bundles_post_ra>
